<compile_context>
chip_gen: v7x
topology: tpu7x:2x2x1
jax: 0.10.0
libtpu: 0.0.40
codegen_flags: <defaults>
</compile_context>

<pallas_src>
import functools

import numpy as np
import jax
import jax.numpy as jnp
from jax.experimental import pallas as pl
from jax.experimental.pallas import tpu as pltpu


_FAST_PATH_TABLE_BYTES = 4 * 1024 * 1024   # whole-table-in-VMEM threshold
_DENSE_PAD_LIMIT = 4 * 1024 * 1024         # allow lane-dense column padding below this
_MAX_BLOCK_ROWS = 64                       # rows gathered per grid step (power of 2, >= 8)
_MAX_BLOCK_BYTES = 512 * 1024              # cap on the (B, Dw) output tile


def _round_up(x, m):
    return ((x + m - 1) // m) * m


def _gather_vmem_kernel(idx_ref, table_ref, o_ref, *, block_rows):
    """Fast path: whole (V, Dw) table resident in VMEM; copy block_rows rows."""
    base = pl.program_id(0) * block_rows
    for r in range(block_rows):                       # static unroll, block_rows <= 64
        row = idx_ref[base + r]                       # scalar read from SMEM
        o_ref[pl.ds(r, 1), :] = table_ref[pl.ds(row, 1), :]


def _gather_dma_kernel(idx_ref, table_ref, o_ref, buf_ref, sem_ref, *, block_rows):
    """General path: table in HBM; double-buffered batched row DMAs."""
    i = pl.program_id(0)
    n = pl.num_programs(0)
    slot = i % 2
    cur = pl.multiple_of(slot * block_rows, block_rows)
    nxt = pl.multiple_of((1 - slot) * block_rows, block_rows)

    def issue(step, sem_idx, slot_base):
        base = step * block_rows
        for r in range(block_rows):
            row = idx_ref[base + r]
            pltpu.make_async_copy(
                table_ref.at[pl.ds(row, 1)],
                buf_ref.at[pl.ds(slot_base + r, 1)],
                sem_ref.at[sem_idx],
            ).start()

    # Prime the pipeline on the very first step.
    @pl.when(i == 0)
    def _prime():
        issue(0, 0, 0)

    # Prefetch the next step's rows into the other buffer half *before* waiting,
    # so their HBM latency overlaps this step's drain + output writeback.
    @pl.when(i + 1 < n)
    def _prefetch():
        issue(i + 1, 1 - slot, nxt)

    # Drain the current slot: one wait per issued row copy (shared per-slot sem).
    for r in range(block_rows):
        pltpu.make_async_copy(
            table_ref.at[pl.ds(0, 1)],                # shape-only placeholder src
            buf_ref.at[pl.ds(cur + r, 1)],
            sem_ref.at[slot],
        ).wait()

    o_ref[...] = buf_ref[pl.ds(cur, block_rows), :]


def gather(input_arr, index, *, vmem_table_limit_bytes=_FAST_PATH_TABLE_BYTES):
    """Pallas-TPU equivalent of PyTorch `input[index]` (axis-0 integer gather).

    Out-of-range indices are clamped to [0, V) instead of raising (torch raises).
    """
    input_arr = jnp.asarray(input_arr)
    index = jnp.asarray(index)

    if input_arr.dtype == jnp.bool_:
        out = gather(input_arr.astype(jnp.uint8), index,
                     vmem_table_limit_bytes=vmem_table_limit_bytes)
        return out.astype(jnp.bool_)

    V = int(input_arr.shape[0])
    trailing = tuple(input_arr.shape[1:])
    D = int(np.prod(trailing)) if trailing else 1
    N = int(np.prod(index.shape))
    dtype = input_arr.dtype
    itemsize = int(input_arr.dtype.itemsize)
    out_shape = tuple(index.shape) + trailing

    if N == 0 or D == 0:
        return jnp.zeros(out_shape, dtype=dtype)
    if V == 0:
        raise ValueError("gather: cannot index into an axis of size 0")
    if V >= 2 ** 31:
        raise NotImplementedError("gather: axis-0 larger than int32 range")
    if itemsize not in (1, 2, 4):
        # TODO(synk): 64-bit dtypes would need a 2x-uint32 split; not needed on TPU.
        raise NotImplementedError(f"gather: unsupported dtype {dtype}")

    table = input_arr.reshape(V, D)
    idx = index.reshape(-1).astype(jnp.int32)
    idx = jnp.where(idx < 0, idx + V, idx)            # torch-style negative indices
    idx = jnp.clip(idx, 0, V - 1)                     # clamp instead of raising on OOB

    # --- column padding (lane density) + repack sub-32-bit dtypes to uint32 ---
    ratio = 4 // itemsize                             # original elements per u32 word
    d_min = _round_up(D, ratio)
    d_dense = _round_up(D, 128 * ratio)
    if V * d_dense * itemsize <= max(_DENSE_PAD_LIMIT, 2 * V * D * itemsize):
        Dp = d_dense                                  # lane-dense rows
    else:
        # TODO(synk): for huge tables with tiny D, repack many rows per lane-dense
        # slab instead of padding; here rows stay unpadded (masked stores).
        Dp = d_min
    if Dp != D:
        table = jnp.pad(table, ((0, 0), (0, Dp - D)))

    if ratio > 1:
        work = jax.lax.bitcast_convert_type(
            table.reshape(V, Dp // ratio, ratio), jnp.uint32)
        work_dtype = jnp.uint32
    else:
        work = table
        work_dtype = dtype
    Dw = Dp // ratio                                  # working (32-bit) row width

    # --- rows per grid step: multiple of 8, capped by tile bytes --------------
    row_bytes = Dw * 4
    B = 8
    while B < _MAX_BLOCK_ROWS and B < N and 2 * B * row_bytes <= _MAX_BLOCK_BYTES:
        B *= 2
    N_pad = _round_up(N, B)
    if N_pad != N:
        idx = jnp.pad(idx, (0, N_pad - N))            # padded slots gather row 0
    grid = (N_pad // B,)

    out_bytes = N_pad * row_bytes
    table_bytes = V * row_bytes

    if table_bytes <= vmem_table_limit_bytes:
        # Fast path: table resident in VMEM, read from HBM exactly once.
        kernel = functools.partial(_gather_vmem_kernel, block_rows=B)
        grid_spec = pltpu.PrefetchScalarGridSpec(
            num_scalar_prefetch=1,
            grid=grid,
            in_specs=[pl.BlockSpec((V, Dw), lambda i, idx_ref: (0, 0))],
            out_specs=pl.BlockSpec((B, Dw), lambda i, idx_ref: (i, 0)),
        )
        out_work = pl.pallas_call(
            kernel,
            out_shape=jax.ShapeDtypeStruct((N_pad, Dw), work_dtype),
            grid_spec=grid_spec,
            compiler_params=pltpu.CompilerParams(
                dimension_semantics=("parallel",),     # v7x: shard over both TCs
                vmem_limit_bytes=32 * 1024 * 1024),
            cost_estimate=pl.CostEstimate(
                flops=0, transcendentals=0,
                bytes_accessed=table_bytes + out_bytes + N_pad * 4),
        )(idx, work)
    else:
        # General path: manual, double-buffered batched row DMAs from HBM.
        kernel = functools.partial(_gather_dma_kernel, block_rows=B)
        grid_spec = pltpu.PrefetchScalarGridSpec(
            num_scalar_prefetch=1,
            grid=grid,
            in_specs=[pl.BlockSpec(memory_space=pl.ANY)],
            out_specs=pl.BlockSpec((B, Dw), lambda i, idx_ref: (i, 0)),
            scratch_shapes=[
                pltpu.VMEM((2 * B, Dw), work_dtype),
                pltpu.SemaphoreType.DMA((2,)),
            ],
        )
        out_work = pl.pallas_call(
            kernel,
            out_shape=jax.ShapeDtypeStruct((N_pad, Dw), work_dtype),
            grid_spec=grid_spec,
            compiler_params=pltpu.CompilerParams(
                # cross-step prefetch carries scratch/sem state => sequential grid
                dimension_semantics=("arbitrary",),
                vmem_limit_bytes=32 * 1024 * 1024),
            cost_estimate=pl.CostEstimate(
                flops=0, transcendentals=0,
                bytes_accessed=2 * out_bytes + N_pad * 4),
        )(idx, work)

    # --- unpack back to the original dtype / shape -----------------------------
    if ratio > 1:
        out_p = jax.lax.bitcast_convert_type(out_work, dtype).reshape(N_pad, Dp)
    else:
        out_p = out_work
    return out_p[:N, :D].reshape(out_shape)


def _check(name, out, ref):
    out = jax.block_until_ready(out)
    assert out.shape == ref.shape, (name, out.shape, ref.shape)
    assert out.dtype == ref.dtype, (name, out.dtype, ref.dtype)
    assert bool(jnp.all(out == ref)), f"{name}: value mismatch"


if __name__ == "__main__":
    key = jax.random.PRNGKey(0)
    k1, k2, k3, k4, k5 = jax.random.split(key, 5)

    # 1) f32 table with trailing dims, small index -> VMEM fast path.
    table1 = jax.random.normal(k1, (32, 4, 32), dtype=jnp.float32)   # D = 128
    idx1 = jax.random.randint(k2, (2, 4), 0, 32, dtype=jnp.int32)
    ref1 = table1[idx1]
    _check("f32/fast", gather(table1, idx1), ref1)

    # 2) Same inputs, forced through the manual-DMA (large-table) path.
    _check("f32/dma", gather(table1, idx1, vmem_table_limit_bytes=0), ref1)

    # 3) bf16 table, unaligned feature dim, negative index, N % B != 0.
    table3 = jax.random.normal(k3, (16, 96), dtype=jnp.bfloat16)
    idx3 = jnp.array([0, 3, -1, 7, 15], dtype=jnp.int32)
    ref3 = table3[idx3]
    _check("bf16/fast", gather(table3, idx3), ref3)
    _check("bf16/dma", gather(table3, idx3, vmem_table_limit_bytes=0), ref3)

    # 4) Enough indices for a multi-step grid (exercises the double-buffered
    #    prefetch in the DMA path and the parallel grid in the fast path).
    table5 = jax.random.normal(k4, (64, 128), dtype=jnp.float32)
    idx5 = jax.random.randint(k5, (200,), 0, 64, dtype=jnp.int32)
    ref5 = table5[idx5]
    _check("f32/fast/multi", gather(table5, idx5), ref5)
    _check("f32/dma/multi", gather(table5, idx5, vmem_table_limit_bytes=0), ref5)

    print("KERNEL_OK")
</pallas_src>

<mosaic_0001>
module attributes {stable_mosaic.version = 11 : i64} {
  func.func @_gather_vmem_kernel(%arg0: i32, %arg1: memref<8xi32, #tpu.memory_space<smem>>, %arg2: memref<32x128xf32, #tpu.memory_space<vmem>>, %arg3: memref<8x128xf32, #tpu.memory_space<vmem>>) attributes {dimension_semantics = [#tpu.dimension_semantics<parallel>], iteration_bounds = array<i64: 1>, scalar_prefetch = 1 : i64, scratch_operands = 0 : i64, tpu.core_type = #tpu.core_type<tc>, window_params = [{pipeline_mode = #tpu.pipeline_mode<synchronous>, transform_indices = @transform_0, window_bounds = array<i64: 32, 128>}, {transform_indices = @transform_1, window_bounds = array<i64: 8, 128>}]} {
    %c8_i32 = arith.constant 8 : i32
    %0 = arith.muli %arg0, %c8_i32 : i32
    %c0_i32 = arith.constant 0 : i32
    %1 = arith.addi %0, %c0_i32 : i32
    %2 = arith.index_cast %1 : i32 to index
    %3 = memref.load %arg1[%2] : memref<8xi32, #tpu.memory_space<smem>>
    %4 = arith.index_cast %3 : i32 to index
    %c0 = arith.constant 0 : index
    %5 = vector.load %arg2[%4, %c0] : memref<32x128xf32, #tpu.memory_space<vmem>>, vector<1x128xf32>
    %c0_0 = arith.constant 0 : index
    %c0_1 = arith.constant 0 : index
    %6 = vector.load %arg3[%c0_0, %c0_1] : memref<8x128xf32, #tpu.memory_space<vmem>>, vector<1x128xf32>
    tpu.vector_store %arg3[%c0_0, %c0_1], %5 {strides = array<i32>} : memref<8x128xf32, #tpu.memory_space<vmem>>, vector<1x128xf32>,
    %c1_i32 = arith.constant 1 : i32
    %7 = arith.addi %0, %c1_i32 : i32
    %8 = arith.index_cast %7 : i32 to index
    %9 = memref.load %arg1[%8] : memref<8xi32, #tpu.memory_space<smem>>
    %10 = arith.index_cast %9 : i32 to index
    %c0_2 = arith.constant 0 : index
    %11 = vector.load %arg2[%10, %c0_2] : memref<32x128xf32, #tpu.memory_space<vmem>>, vector<1x128xf32>
    %c1 = arith.constant 1 : index
    %c0_3 = arith.constant 0 : index
    %12 = vector.load %arg3[%c1, %c0_3] : memref<8x128xf32, #tpu.memory_space<vmem>>, vector<1x128xf32>
    tpu.vector_store %arg3[%c1, %c0_3], %11 {strides = array<i32>} : memref<8x128xf32, #tpu.memory_space<vmem>>, vector<1x128xf32>,
    %c2_i32 = arith.constant 2 : i32
    %13 = arith.addi %0, %c2_i32 : i32
    %14 = arith.index_cast %13 : i32 to index
    %15 = memref.load %arg1[%14] : memref<8xi32, #tpu.memory_space<smem>>
    %16 = arith.index_cast %15 : i32 to index
    %c0_4 = arith.constant 0 : index
    %17 = vector.load %arg2[%16, %c0_4] : memref<32x128xf32, #tpu.memory_space<vmem>>, vector<1x128xf32>
    %c2 = arith.constant 2 : index
    %c0_5 = arith.constant 0 : index
    %18 = vector.load %arg3[%c2, %c0_5] : memref<8x128xf32, #tpu.memory_space<vmem>>, vector<1x128xf32>
    tpu.vector_store %arg3[%c2, %c0_5], %17 {strides = array<i32>} : memref<8x128xf32, #tpu.memory_space<vmem>>, vector<1x128xf32>,
    %c3_i32 = arith.constant 3 : i32
    %19 = arith.addi %0, %c3_i32 : i32
    %20 = arith.index_cast %19 : i32 to index
    %21 = memref.load %arg1[%20] : memref<8xi32, #tpu.memory_space<smem>>
    %22 = arith.index_cast %21 : i32 to index
    %c0_6 = arith.constant 0 : index
    %23 = vector.load %arg2[%22, %c0_6] : memref<32x128xf32, #tpu.memory_space<vmem>>, vector<1x128xf32>
    %c3 = arith.constant 3 : index
    %c0_7 = arith.constant 0 : index
    %24 = vector.load %arg3[%c3, %c0_7] : memref<8x128xf32, #tpu.memory_space<vmem>>, vector<1x128xf32>
    tpu.vector_store %arg3[%c3, %c0_7], %23 {strides = array<i32>} : memref<8x128xf32, #tpu.memory_space<vmem>>, vector<1x128xf32>,
    %c4_i32 = arith.constant 4 : i32
    %25 = arith.addi %0, %c4_i32 : i32
    %26 = arith.index_cast %25 : i32 to index
    %27 = memref.load %arg1[%26] : memref<8xi32, #tpu.memory_space<smem>>
    %28 = arith.index_cast %27 : i32 to index
    %c0_8 = arith.constant 0 : index
    %29 = vector.load %arg2[%28, %c0_8] : memref<32x128xf32, #tpu.memory_space<vmem>>, vector<1x128xf32>
    %c4 = arith.constant 4 : index
    %c0_9 = arith.constant 0 : index
    %30 = vector.load %arg3[%c4, %c0_9] : memref<8x128xf32, #tpu.memory_space<vmem>>, vector<1x128xf32>
    tpu.vector_store %arg3[%c4, %c0_9], %29 {strides = array<i32>} : memref<8x128xf32, #tpu.memory_space<vmem>>, vector<1x128xf32>,
    %c5_i32 = arith.constant 5 : i32
    %31 = arith.addi %0, %c5_i32 : i32
    %32 = arith.index_cast %31 : i32 to index
    %33 = memref.load %arg1[%32] : memref<8xi32, #tpu.memory_space<smem>>
    %34 = arith.index_cast %33 : i32 to index
    %c0_10 = arith.constant 0 : index
    %35 = vector.load %arg2[%34, %c0_10] : memref<32x128xf32, #tpu.memory_space<vmem>>, vector<1x128xf32>
    %c5 = arith.constant 5 : index
    %c0_11 = arith.constant 0 : index
    %36 = vector.load %arg3[%c5, %c0_11] : memref<8x128xf32, #tpu.memory_space<vmem>>, vector<1x128xf32>
    tpu.vector_store %arg3[%c5, %c0_11], %35 {strides = array<i32>} : memref<8x128xf32, #tpu.memory_space<vmem>>, vector<1x128xf32>,
    %c6_i32 = arith.constant 6 : i32
    %37 = arith.addi %0, %c6_i32 : i32
    %38 = arith.index_cast %37 : i32 to index
    %39 = memref.load %arg1[%38] : memref<8xi32, #tpu.memory_space<smem>>
    %40 = arith.index_cast %39 : i32 to index
    %c0_12 = arith.constant 0 : index
    %41 = vector.load %arg2[%40, %c0_12] : memref<32x128xf32, #tpu.memory_space<vmem>>, vector<1x128xf32>
    %c6 = arith.constant 6 : index
    %c0_13 = arith.constant 0 : index
    %42 = vector.load %arg3[%c6, %c0_13] : memref<8x128xf32, #tpu.memory_space<vmem>>, vector<1x128xf32>
    tpu.vector_store %arg3[%c6, %c0_13], %41 {strides = array<i32>} : memref<8x128xf32, #tpu.memory_space<vmem>>, vector<1x128xf32>,
    %c7_i32 = arith.constant 7 : i32
    %43 = arith.addi %0, %c7_i32 : i32
    %44 = arith.index_cast %43 : i32 to index
    %45 = memref.load %arg1[%44] : memref<8xi32, #tpu.memory_space<smem>>
    %46 = arith.index_cast %45 : i32 to index
    %c0_14 = arith.constant 0 : index
    %47 = vector.load %arg2[%46, %c0_14] : memref<32x128xf32, #tpu.memory_space<vmem>>, vector<1x128xf32>
    %c7 = arith.constant 7 : index
    %c0_15 = arith.constant 0 : index
    %48 = vector.load %arg3[%c7, %c0_15] : memref<8x128xf32, #tpu.memory_space<vmem>>, vector<1x128xf32>
    tpu.vector_store %arg3[%c7, %c0_15], %47 {strides = array<i32>} : memref<8x128xf32, #tpu.memory_space<vmem>>, vector<1x128xf32>,
    return
  }
  func.func @transform_0(%arg0: i32, %arg1: memref<8xi32, #tpu.memory_space<smem>>) -> (i32, i32) {
    %c0_i32 = arith.constant 0 : i32
    %c0_i32_0 = arith.constant 0 : i32
    %c0_i32_1 = arith.constant 0 : i32
    return %c0_i32, %c0_i32_0 : i32, i32
  }
  func.func @transform_1(%arg0: i32, %arg1: memref<8xi32, #tpu.memory_space<smem>>) -> (i32, i32) {
    %c0_i32 = arith.constant 0 : i32
    %c0_i32_0 = arith.constant 0 : i32
    return %arg0, %c0_i32 : i32, i32
  }
}

</mosaic_0001>

<bundles_post_ra>
// kernel: tpu_custom_call.1
= control target key start
LH: loop header
LB: loop body
LE: loop exit
PB: predicated region body
PF: predicated region fallthrough
CT: control target
= control target key end

     0   :  { %s226_s0 = inlined_call_operand.hbm [shape: s32[8], index: 0, kind: input, shape index: {}]   ;;  %s227_s1 = inlined_call_operand.hbm [shape: f32[32,128], index: 1, kind: input, shape index: {}]   ;;  %s228_s2 = inlined_call_operand.hbm [shape: f32[8,128], index: 2, kind: output, shape index: {}]  }
   0x1   :  { %s103_s11 = scalar_lea.hbm %s226_s0, 16 }
   0x2   :  { %p104_p0 = scmp.ne.s32.totalorder %s226_s0, %s103_s11  ;;  %p107_p1 = scmp.lt.u32.totalorder %s103_s11, %s226_s0 }
   0x4   :  { %p109_p2 = pnand %p107_p1, %p104_p0 }
   0x6   :  { %112 = shalt.err (!%p109_p2)  }
   0x7   :  { %s163_s16 = smov [#allocation3]  }
   0x8   :  { %8 = dma.hbm_to_smem %s226_s0, 16, %s163_s16, [#allocation2] }
   0x9   :  { %157 = dma.done.wait [#allocation2], 16 }
   0xa   :  { %158 = vsyncadd [#allocation2], 4294967280 }
   0xb   :  { %10 = sfence }
   0xc   :  { %11 = vsyncpa [#allocation5], 0 }
   0xd   :  { %12 = vsyncpa [#allocation6], 0  ;;  %s164_s19 = smov [#allocation4]   ;;  %s113_s23 = scalar_lea.hbm %s227_s1, 512 }
   0xe   :  { %s18_s20 = sshll.u32 %s164_s19, 4  ;;  %p114_p3 = scmp.ne.s32.totalorder %s227_s1, %s113_s23  ;;  %s19_s20 = int_to_ptr.vmem [resolvable:$true] %s18_s20 }
   0xf   :  { %p117_p4 = scmp.lt.u32.totalorder %s113_s23, %s227_s1 }
  0x11   :  { %p119_p5 = pnand %p117_p4, %p114_p3 }
  0x13   :  { %122 = shalt.err (!%p119_p5)
}
  0x14   :  { %s123_s0 = scalar_lea.vmem %s19_s20, 512  ;;  %p128_p7 = scmp.lt.s32.totalorder %s19_s20, %s19_s20 }
  0x15   :  { %p124_p6 = scmp.ne.s32.totalorder %s19_s20, %s123_s0  ;;  %p129_p8 = scmp.lt.s32.totalorder %s123_s0, %s123_s0 }
  0x17   :  { %p130_p9 = por %p129_p8, %p128_p7 }
  0x19   :  { %p131_p10 = pnand %p130_p9, %p124_p6 }
  0x1b   :  { %134 = shalt.err (!%p131_p10)
}
  0x1c   :  { %s165_s28 = smov 128   ;;  %s166_s29 = smov 8  }
  0x1d   :  { %24 = dma.hbm_to_vmem [thread:$0]  %s227_s1, 512, %s19_s20, [#allocation5], %s165_s28, %s165_s28, %s166_s29  }
  0x1e   :  { %159 = dma.done.wait [#allocation5], 512  }
  0x1f   :  { %160 = vsyncadd [#allocation5], 4294966784  ;;  %s29_s4 = sld [smem:[#allocation3]]  ;;  %s91_s5 = sld [smem:[#allocation3 + $0x1]] }
  0x20   :  { %s92_s6 = sld [smem:[#allocation3 + $0x2]]  ;;  %s93_s7 = sld [smem:[#allocation3 + $0x3]] }
  0x21   :  { %s94_s8 = sld [smem:[#allocation3 + $0x4]]  ;;  %s95_s9 = sld [smem:[#allocation3 + $0x5]] }
  0x22   :  { %s96_s10 = sld [smem:[#allocation3 + $0x6]]  ;;  %s97_s11 = sld [smem:[#allocation3 + $0x7]] }
  0x23   :  { %s167_s12 = smov [#allocation7]  }
  0x24   :  { %s74_s13 = sshll.u32 %s167_s12, 4  ;;  %s207_s13 = int_to_ptr.vmem [resolvable:$true] %s74_s13 }
  0x25   :  { %s30_s14 = scalar_lea.vmem [#allocation4], %s29_s4  ;;  %s35_s15 = scalar_lea.vmem [#allocation4], %s91_s5 }
  0x26   :  { %v31_v0 = vld [vmem:[%s30_s14] sm:$0x1]  ;;  %s40_s1 = scalar_lea.vmem [#allocation4], %s92_s6  ;;  %s45_s16 = scalar_lea.vmem [#allocation4], %s93_s7 }
  0x27   :  { %v36_v1 = vld [vmem:[%s35_s15] sm:$0x1]  ;;  %32 = vst [vmem:[#allocation7] sm:$0x1] %v31_v0  ;;  %s50_s17 = scalar_lea.vmem [#allocation4], %s94_s8  ;;  %s55_s18 = scalar_lea.vmem [#allocation4], %s95_s9 }
  0x28   :  { %37 = vst [vmem:[#allocation7 + $0x1] sm:$0x1] %v36_v1  ;;  %v41_v2 = vld [vmem:[%s40_s1] sm:$0x1]  ;;  %s60_s19 = scalar_lea.vmem [#allocation4], %s96_s10  ;;  %s65_s20 = scalar_lea.vmem [#allocation4], %s97_s11 }
  0x29   :  { %v46_v3 = vld [vmem:[%s45_s16] sm:$0x1]  ;;  %42 = vst [vmem:[#allocation7 + $0x2] sm:$0x1] %v41_v2  ;;  %s135_s21 = scalar_lea.vmem %s207_s13, 128  ;;  %p140_p12 = scmp.lt.s32.totalorder %s207_s13, %s207_s13 }
  0x2a   :  { %47 = vst [vmem:[#allocation7 + $0x3] sm:$0x1] %v46_v3  ;;  %v51_v4 = vld [vmem:[%s50_s17] sm:$0x1]  ;;  %p136_p11 = scmp.ne.s32.totalorder %s207_s13, %s135_s21  ;;  %p141_p13 = scmp.lt.s32.totalorder %s135_s21, %s135_s21 }
  0x2b   :  { %v56_v5 = vld [vmem:[%s55_s18] sm:$0x1]  ;;  %52 = vst [vmem:[#allocation7 + $0x4] sm:$0x1] %v51_v4 }
  0x2c   :  { %57 = vst [vmem:[#allocation7 + $0x5] sm:$0x1] %v56_v5  ;;  %v61_v6 = vld [vmem:[%s60_s19] sm:$0x1]  ;;  %p142_p0 = por %p141_p13, %p140_p12 }
  0x2d   :  { %v66_v7 = vld [vmem:[%s65_s20] sm:$0x1]  ;;  %62 = vst [vmem:[#allocation7 + $0x6] sm:$0x1] %v61_v6 }
  0x2e   :  { %67 = vst [vmem:[#allocation7 + $0x7] sm:$0x1] %v66_v7  ;;  %p143_p1 = pnand %p142_p0, %p136_p11 }
  0x30   :  { %146 = shalt.err (!%p143_p1)
}
  0x31   :  { %s147_s24 = scalar_lea.hbm %s228_s2, 128 }
  0x32   :  { %p148_p2 = scmp.ne.s32.totalorder %s228_s2, %s147_s24  ;;  %p151_p3 = scmp.lt.u32.totalorder %s147_s24, %s228_s2 }
  0x34   :  { %p153_p4 = pnand %p151_p3, %p148_p2 }
  0x36   :  { %156 = shalt.err (!%p153_p4)
}
  0x37   :  { %77 = dma.vmem_to_hbm [thread:$0]  %s207_s13, 128, %s228_s2, [#allocation6]  }
  0x38   :  { %161 = dma.done.wait [#allocation6], 128  }
  0x39   :  { %162 = vsyncadd [#allocation6], 4294967168 }
  0x3a   :  { %81 = vsyncpa [#allocation5], 1 }
  0x3b   :  { %82 = vsyncpa [#allocation6], 1 }

</bundles_post_ra>
